<compile_context>
chip_gen: v5e
topology: v5e:2x2
jax: 0.10.0
libtpu: 0.0.40
codegen_flags: <defaults>
</compile_context>

<pallas_src>
import numpy as np
import jax
import jax.numpy as jnp
from jax.experimental import pallas as pl
from jax.experimental.pallas import tpu as pltpu

GRID_SIZE = 5
SPLINE_ORDER = 3  # unused by the reference forward pass (kept for parity)

# Uniform knots of torch.linspace(-1, 1, GRID_SIZE); h = 2/(G-1) and 1/h below.
_KNOTS = tuple(float(v) for v in np.linspace(-1.0, 1.0, GRID_SIZE))
_INV_H = (GRID_SIZE - 1) / 2.0

_TARGET_BLOCK_BYTES = 2 * 1024 * 1024  # ~2 MiB per block buffer
_MIN_GRID_STEPS = 4                    # keep both v7x TensorCores fed


def _bspline_kernel(coef_ref, x_ref, o_ref):
    # coef_ref: SMEM (GRID_SIZE,) f32 (scalar-prefetched, read as scalars)
    # x_ref / o_ref: VMEM (block_rows, lanes) tiles in the caller's dtype
    x = x_ref[...].astype(jnp.float32)

    # ReLU-at-knot cumulative form (uniform grid). Scalar f_k from SMEM.
    acc = None
    prev_slope = 0.0
    for k in range(GRID_SIZE - 1):  # static Python loop, unrolled at trace time
        slope = (coef_ref[k + 1] - coef_ref[k]) * _INV_H  # scalar (sreg)
        f_k = slope - prev_slope                           # scalar (sreg)
        ramp = f_k * jnp.maximum(x - _KNOTS[k], 0.0)
        acc = ramp if acc is None else acc + ramp
        prev_slope = slope
    out = coef_ref[0] + acc

    # Reference semantics: x >= 1 (strict upper bound after clamp) and NaN -> 0.
    o_ref[...] = jnp.where(x < 1.0, out, 0.0).astype(o_ref.dtype)


def _bspline_jnp(x_f32, coef_f32):
    """Plain-jnp fallback for sub-128-element tails / tiny inputs."""
    acc = jnp.full_like(x_f32, coef_f32[0])
    prev_slope = 0.0
    for k in range(GRID_SIZE - 1):
        slope = (coef_f32[k + 1] - coef_f32[k]) * _INV_H
        f_k = slope - prev_slope
        acc = acc + f_k * jnp.maximum(x_f32 - _KNOTS[k], 0.0)
        prev_slope = slope
    return jnp.where(x_f32 < 1.0, acc, 0.0)


def bspline_activation(x, coefficients):
    """Apply the B-spline activation elementwise. x: any shape, float dtype."""
    orig_shape = x.shape
    orig_dtype = x.dtype
    coef = coefficients.astype(jnp.float32)

    # Stream the kernel in the caller's dtype when it is a supported float
    # type (bf16/f16/f32); the kernel upcasts internally.
    if orig_dtype in (jnp.float32, jnp.bfloat16, jnp.float16):
        io_dtype = orig_dtype
    else:
        io_dtype = jnp.float32

    x_flat = x.reshape(-1)
    if x_flat.dtype != io_dtype:
        x_flat = x_flat.astype(io_dtype)
    n = x_flat.shape[0]
    itemsize = np.dtype(io_dtype).itemsize
    sub = 32 // itemsize  # sublane multiple: 8 for f32, 16 for bf16/f16

    # Lane width: multiple of 128, wider when it divides n (lane-dense stores).
    lanes = 128
    for cand in (1024, 512, 256, 128):
        if n % cand == 0:
            lanes = cand
            break

    n_bulk = (n // lanes) * lanes  # 128-aligned bulk -> kernel
    tail = n - n_bulk              # < 128 leftover elements -> plain jnp

    out_parts = []
    if n_bulk > 0:
        rows = n_bulk // lanes
        x_bulk = x_flat if tail == 0 else x_flat[:n_bulk]
        x2d = x_bulk.reshape(rows, lanes)

        # ~2 MiB per buffer, sublane-aligned; additionally capped so medium
        # inputs still produce >= _MIN_GRID_STEPS grid steps (v7x megacore).
        target_rows = max(sub, (_TARGET_BLOCK_BYTES // (lanes * itemsize)) // sub * sub)
        split_rows = max(sub, pl.cdiv(pl.cdiv(rows, _MIN_GRID_STEPS), sub) * sub)
        block_rows = min(rows, target_rows, split_rows)

        grid = (pl.cdiv(rows, block_rows),)
        grid_spec = pltpu.PrefetchScalarGridSpec(
            num_scalar_prefetch=1,  # coefficients -> SMEM
            grid=grid,
            in_specs=[pl.BlockSpec((block_rows, lanes), lambda i, c: (i, 0))],
            out_specs=pl.BlockSpec((block_rows, lanes), lambda i, c: (i, 0)),
        )
        out2d = pl.pallas_call(
            _bspline_kernel,
            out_shape=jax.ShapeDtypeStruct((rows, lanes), io_dtype),
            grid_spec=grid_spec,
            compiler_params=pltpu.CompilerParams(
                dimension_semantics=("parallel",),  # shard grid across TCs
            ),
        )(coef, x2d)
        out_parts.append(out2d.reshape(-1))

    if tail > 0:
        # Tiny ragged tail (< 128 elements): not worth a kernel launch.
        x_tail = x_flat[n_bulk:].astype(jnp.float32)
        out_parts.append(_bspline_jnp(x_tail, coef).astype(io_dtype))

    out_flat = out_parts[0] if len(out_parts) == 1 else jnp.concatenate(out_parts)
    out = out_flat.reshape(orig_shape)
    if out.dtype != orig_dtype:
        out = out.astype(orig_dtype)
    return out


def _reference(x, coefficients):
    """Pure-numpy reference mirroring the PyTorch forward exactly."""
    x = np.clip(np.asarray(x, dtype=np.float32), -1.0, 1.0)
    grid = np.linspace(-1.0, 1.0, GRID_SIZE).astype(np.float32)
    coef = np.asarray(coefficients, dtype=np.float32)
    out = np.zeros_like(x)
    for i in range(GRID_SIZE - 1):
        mask = (x >= grid[i]) & (x < grid[i + 1])
        t = (x[mask] - grid[i]) / (grid[i + 1] - grid[i])
        out[mask] = (1.0 - t) * coef[i] + t * coef[i + 1]
    return out


if __name__ == "__main__":
    key = jax.random.PRNGKey(0)
    k_coef, k_x = jax.random.split(key)

    # Parameter init: torch.randn(grid_size) -> standard normal, deterministic.
    coefficients = jax.random.normal(k_coef, (GRID_SIZE,), dtype=jnp.float32)

    # Example input in NCHW, scaled past [-1, 1] to exercise the clamp/strict-bound paths.
    x = 1.5 * jax.random.normal(k_x, (2, 4, 16, 16), dtype=jnp.float32)

    out = bspline_activation(x, coefficients)
    out = jax.block_until_ready(out)

    ref = _reference(np.asarray(x), np.asarray(coefficients))
    np.testing.assert_allclose(np.asarray(out), ref, rtol=1e-5, atol=1e-5)

    print("KERNEL_OK")
</pallas_src>

<mosaic_0001>
module attributes {stable_mosaic.version = 11 : i64} {
  func.func @_bspline_kernel(%arg0: i32, %arg1: memref<5xf32, #tpu.memory_space<smem>>, %arg2: memref<2x1024xf32, #tpu.memory_space<vmem>>, %arg3: memref<2x1024xf32, #tpu.memory_space<vmem>>) attributes {dimension_semantics = [#tpu.dimension_semantics<parallel>], iteration_bounds = array<i64: 1>, scalar_prefetch = 1 : i64, scratch_operands = 0 : i64, tpu.core_type = #tpu.core_type<tc>, window_params = [{transform_indices = @transform_0, window_bounds = array<i64: 2, 1024>}, {transform_indices = @transform_1, window_bounds = array<i64: 2, 1024>}]} {
    %c0 = arith.constant 0 : index
    %c0_0 = arith.constant 0 : index
    %0 = vector.load %arg2[%c0, %c0_0] : memref<2x1024xf32, #tpu.memory_space<vmem>>, vector<2x1024xf32>
    %c1 = arith.constant 1 : index
    %1 = memref.load %arg1[%c1] : memref<5xf32, #tpu.memory_space<smem>>
    %c0_1 = arith.constant 0 : index
    %2 = memref.load %arg1[%c0_1] : memref<5xf32, #tpu.memory_space<smem>>
    %3 = arith.subf %1, %2 : f32
    %cst = arith.constant 2.000000e+00 : f32
    %4 = arith.mulf %3, %cst : f32
    %cst_2 = arith.constant 0.000000e+00 : f32
    %5 = arith.subf %4, %cst_2 : f32
    %cst_3 = arith.constant -1.000000e+00 : f32
    %6 = vector.broadcast %cst_3 : f32 to vector<2x1024xf32>
    %7 = arith.subf %0, %6 : vector<2x1024xf32>
    %cst_4 = arith.constant 0.000000e+00 : f32
    %8 = vector.broadcast %cst_4 : f32 to vector<2x1024xf32>
    %9 = arith.maximumf %7, %8 : vector<2x1024xf32>
    %10 = vector.broadcast %5 : f32 to vector<2x1024xf32>
    %11 = arith.mulf %10, %9 : vector<2x1024xf32>
    %c2 = arith.constant 2 : index
    %12 = memref.load %arg1[%c2] : memref<5xf32, #tpu.memory_space<smem>>
    %c1_5 = arith.constant 1 : index
    %13 = memref.load %arg1[%c1_5] : memref<5xf32, #tpu.memory_space<smem>>
    %14 = arith.subf %12, %13 : f32
    %cst_6 = arith.constant 2.000000e+00 : f32
    %15 = arith.mulf %14, %cst_6 : f32
    %16 = arith.subf %15, %4 : f32
    %cst_7 = arith.constant -5.000000e-01 : f32
    %17 = vector.broadcast %cst_7 : f32 to vector<2x1024xf32>
    %18 = arith.subf %0, %17 : vector<2x1024xf32>
    %cst_8 = arith.constant 0.000000e+00 : f32
    %19 = vector.broadcast %cst_8 : f32 to vector<2x1024xf32>
    %20 = arith.maximumf %18, %19 : vector<2x1024xf32>
    %21 = vector.broadcast %16 : f32 to vector<2x1024xf32>
    %22 = arith.mulf %21, %20 : vector<2x1024xf32>
    %23 = arith.addf %11, %22 : vector<2x1024xf32>
    %c3 = arith.constant 3 : index
    %24 = memref.load %arg1[%c3] : memref<5xf32, #tpu.memory_space<smem>>
    %c2_9 = arith.constant 2 : index
    %25 = memref.load %arg1[%c2_9] : memref<5xf32, #tpu.memory_space<smem>>
    %26 = arith.subf %24, %25 : f32
    %cst_10 = arith.constant 2.000000e+00 : f32
    %27 = arith.mulf %26, %cst_10 : f32
    %28 = arith.subf %27, %15 : f32
    %cst_11 = arith.constant 0.000000e+00 : f32
    %29 = vector.broadcast %cst_11 : f32 to vector<2x1024xf32>
    %30 = arith.subf %0, %29 : vector<2x1024xf32>
    %cst_12 = arith.constant 0.000000e+00 : f32
    %31 = vector.broadcast %cst_12 : f32 to vector<2x1024xf32>
    %32 = arith.maximumf %30, %31 : vector<2x1024xf32>
    %33 = vector.broadcast %28 : f32 to vector<2x1024xf32>
    %34 = arith.mulf %33, %32 : vector<2x1024xf32>
    %35 = arith.addf %23, %34 : vector<2x1024xf32>
    %c4 = arith.constant 4 : index
    %36 = memref.load %arg1[%c4] : memref<5xf32, #tpu.memory_space<smem>>
    %c3_13 = arith.constant 3 : index
    %37 = memref.load %arg1[%c3_13] : memref<5xf32, #tpu.memory_space<smem>>
    %38 = arith.subf %36, %37 : f32
    %cst_14 = arith.constant 2.000000e+00 : f32
    %39 = arith.mulf %38, %cst_14 : f32
    %40 = arith.subf %39, %27 : f32
    %cst_15 = arith.constant 5.000000e-01 : f32
    %41 = vector.broadcast %cst_15 : f32 to vector<2x1024xf32>
    %42 = arith.subf %0, %41 : vector<2x1024xf32>
    %cst_16 = arith.constant 0.000000e+00 : f32
    %43 = vector.broadcast %cst_16 : f32 to vector<2x1024xf32>
    %44 = arith.maximumf %42, %43 : vector<2x1024xf32>
    %45 = vector.broadcast %40 : f32 to vector<2x1024xf32>
    %46 = arith.mulf %45, %44 : vector<2x1024xf32>
    %47 = arith.addf %35, %46 : vector<2x1024xf32>
    %c0_17 = arith.constant 0 : index
    %48 = memref.load %arg1[%c0_17] : memref<5xf32, #tpu.memory_space<smem>>
    %49 = vector.broadcast %48 : f32 to vector<2x1024xf32>
    %50 = arith.addf %49, %47 : vector<2x1024xf32>
    %cst_18 = arith.constant 1.000000e+00 : f32
    %51 = vector.broadcast %cst_18 : f32 to vector<2x1024xf32>
    %52 = arith.cmpf olt, %0, %51 : vector<2x1024xf32>
    %cst_19 = arith.constant 0.000000e+00 : f32
    %53 = vector.broadcast %cst_19 : f32 to vector<2x1024xf32>
    %54 = arith.select %52, %50, %53 : vector<2x1024xi1>, vector<2x1024xf32>
    %c0_20 = arith.constant 0 : index
    %c0_21 = arith.constant 0 : index
    %55 = vector.load %arg3[%c0_20, %c0_21] : memref<2x1024xf32, #tpu.memory_space<vmem>>, vector<2x1024xf32>
    tpu.vector_store %arg3[%c0_20, %c0_21], %54 {strides = array<i32>} : memref<2x1024xf32, #tpu.memory_space<vmem>>, vector<2x1024xf32>,
    return
  }
  func.func @transform_0(%arg0: i32, %arg1: memref<5xf32, #tpu.memory_space<smem>>) -> (i32, i32) {
    %c0_i32 = arith.constant 0 : i32
    %c0_i32_0 = arith.constant 0 : i32
    return %arg0, %c0_i32 : i32, i32
  }
  func.func @transform_1(%arg0: i32, %arg1: memref<5xf32, #tpu.memory_space<smem>>) -> (i32, i32) {
    %c0_i32 = arith.constant 0 : i32
    %c0_i32_0 = arith.constant 0 : i32
    return %arg0, %c0_i32 : i32, i32
  }
}

</mosaic_0001>

<bundles_post_ra>
// kernel: tpu_custom_call.1
= control target key start
LH: loop header
LB: loop body
LE: loop exit
PB: predicated region body
PF: predicated region fallthrough
CT: control target
= control target key end

     0   :  { %s187_s12 = smov [#allocation3]   ;;  %s218_s0 = inlined_call_operand.hbm [shape: f32[5], index: 0, kind: input, shape index: {}]   ;;  %s219_s1 = inlined_call_operand.hbm [shape: f32[2,1024], index: 1, kind: input, shape index: {}]   ;;  %s220_s2 = inlined_call_operand.hbm [shape: f32[2,1024], index: 2, kind: output, shape index: {}]  }
   0x1   :  { %s8_s11 = sshll.u32 %s218_s0, 4  ;;  %s9_s11 = int_to_ptr.hbm [resolvable:$true] %s8_s11 }
   0x2   :  { %11 = dma.hbm_to_smem %s9_s11, 16, %s187_s12, [#allocation2] }
   0x3   :  { %181 = dma.done.wait [#allocation2], 16 }
   0x4   :  { %182 = vsyncadd [#allocation2], 4294967280 }
   0x5   :  { %14 = sfence }
   0x6   :  { %15 = vsyncpa [#allocation5], 0 }
   0x7   :  { %16 = vsyncpa [#allocation6], 0  ;;  %s22_s15 = sshll.u32 %s219_s1, 4  ;;  %s188_s16 = smov [#allocation4]   ;;  %s23_s15 = int_to_ptr.hbm [resolvable:$true] %s22_s15 }
   0x8   :  { %s24_s17 = sshll.u32 %s188_s16, 4  ;;  %s25_s17 = int_to_ptr.vmem [resolvable:$true] %s24_s17 }
   0x9   :  { %27 = dma.hbm_to_vmem [thread:$0]  %s23_s15, 256, %s25_s17, [#allocation5]  }
   0xa   :  { %183 = dma.done.wait [#allocation5], 256  }
   0xb   :  { %184 = vsyncadd [#allocation5], 4294967040  ;;  %s108_s0 = sld [smem:[#allocation3 + $0x1]]  ;;  %v32_v0 = vld [vmem:[#allocation4] sm:$0xff]  ;;  %v33_v1 = vld [vmem:[#allocation4 + $0x8] sm:$0xff]  ;;  %s189_s4 = smov [#allocation7]  }
   0xc   :  { %s211_s18 = sld [smem:[#allocation3]]  ;;  %v109_v2 = vadd.f32 1.0, %v32_v0  ;;  %v112_v3 = vadd.f32 0.5, %v32_v0  ;;  %v110_v4 = vadd.f32 1.0, %v33_v1  ;;  %v113_v5 = vadd.f32 0.5, %v33_v1  ;;  %s96_s5 = sshll.u32 %s189_s4, 4  ;;  %s97_s5 = int_to_ptr.vmem [resolvable:$true] %s96_s5 }
   0xd   :  { %s111_s19 = sld [smem:[#allocation3 + $0x2]]  ;;  %v116_v7 = vadd.f32 -0.5, %v32_v0  ;;  %v117_v9 = vadd.f32 -0.5, %v33_v1  ;;  %v62_v13 = vmax.f32 %v32_v0, 0.0  ;;  %v63_v14 = vmax.f32 %v33_v1, 0.0  ;;  %s98_s8 = sshll.u32 %s220_s2, 4  ;;  %s99_s8 = int_to_ptr.hbm [resolvable:$true] %s98_s8 }
   0xe   :  { %s114_s20 = sld [smem:[#allocation3 + $0x3]]  ;;  %v40_v6 = vmax.f32 %v109_v2, 0.0  ;;  %v41_v8 = vmax.f32 %v110_v4, 0.0  ;;  %v51_v11 = vmax.f32 %v112_v3, 0.0  ;;  %v52_v12 = vmax.f32 %v113_v5, 0.0 }
   0xf   :  { %s115_s21 = sld [smem:[#allocation3 + $0x4]]  ;;  %v75_v16 = vmax.f32 %v116_v7, 0.0  ;;  %v76_v18 = vmax.f32 %v117_v9, 0.0  ;;  %vm85_vm0 = vcmp.lt.f32.partialorder %v32_v0, 1.0  ;;  %vm86_vm1 = vcmp.lt.f32.partialorder %v33_v1, 1.0 }
  0x12   :  { %s36_s22 = ssub.f32 %s108_s0, %s211_s18  ;;  %v82_v32 = vstv %s211_s18 }
  0x13   :  { %s46_s1 = ssub.f32 %s111_s19, %s108_s0 }
  0x14   :  { %s37_s23 = smul.f32 2.0, %s36_s22  ;;  %s59_s24 = ssub.f32 %s114_s20, %s111_s19 }
  0x15   :  { %s47_s25 = smul.f32 2.0, %s46_s1  ;;  %s70_s26 = ssub.f32 %s115_s21, %s114_s20 }
  0x16   :  { %v42_v10 = vstv %s37_s23  ;;  %s60_s27 = smul.f32 2.0, %s59_s24 }
  0x17   :  { %s48_s28 = ssub.f32 %s47_s25, %s37_s23  ;;  %s71_s29 = smul.f32 2.0, %s70_s26  ;;  %v43_v15 = vmul.f32 %v42_v10, %v40_v6  ;;  %v44_v17 = vmul.f32 %v42_v10, %v41_v8 }
  0x18   :  { %s61_s30 = ssub.f32 %s60_s27, %s47_s25 }
  0x19   :  { %v53_v19 = vstv %s48_s28  ;;  %s72_s3 = ssub.f32 %s71_s29, %s60_s27 }
  0x1a   :  { %v54_v20 = vmul.f32 %v53_v19, %v51_v11  ;;  %v64_v21 = vstv %s61_s30  ;;  %v55_v22 = vmul.f32 %v53_v19, %v52_v12 }
  0x1b   :  { %v65_v23 = vmul.f32 %v64_v21, %v62_v13  ;;  %v77_v24 = vstv %s72_s3  ;;  %v66_v25 = vmul.f32 %v64_v21, %v63_v14 }
  0x1c   :  { %v56_v26 = vadd.f32 %v54_v20, %v43_v15  ;;  %v78_v27 = vmul.f32 %v77_v24, %v75_v16  ;;  %v57_v28 = vadd.f32 %v55_v22, %v44_v17  ;;  %v79_v29 = vmul.f32 %v77_v24, %v76_v18 }
  0x1e   :  { %v67_v30 = vadd.f32 %v65_v23, %v56_v26  ;;  %v68_v31 = vadd.f32 %v66_v25, %v57_v28 }
  0x20   :  { %v80_v33 = vadd.f32 %v78_v27, %v67_v30  ;;  %v81_v34 = vadd.f32 %v79_v29, %v68_v31 }
  0x22   :  { %v83_v35 = vadd.f32 %v82_v32, %v80_v33  ;;  %v84_v36 = vadd.f32 %v82_v32, %v81_v34 }
  0x24   :  { %v87_v37 = vsel %vm85_vm0, %v83_v35, 0.0  ;;  %v88_v38 = vsel %vm86_vm1, %v84_v36, 0.0 }
  0x25   :  { %89 = vst [vmem:[#allocation7] sm:$0xff] %v87_v37 }
  0x26   :  { %90 = vst [vmem:[#allocation7 + $0x8] sm:$0xff] %v88_v38 }
  0x27   :  { %101 = dma.vmem_to_hbm [thread:$0]  %s97_s5, 256, %s99_s8, [#allocation6]  }
  0x28   :  { %185 = dma.done.wait [#allocation6], 256  }
  0x29   :  { %186 = vsyncadd [#allocation6], 4294967040 }
  0x2a   :  { %106 = vsyncpa [#allocation5], 1 }
  0x2b   :  { %107 = vsyncpa [#allocation6], 1 }

</bundles_post_ra>
